<compile_context>
chip_gen: v7x
topology: tpu7x:2x2x1
jax: 0.10.0
libtpu: 0.0.40
codegen_flags: <defaults>
</compile_context>

<pallas_src>
import jax
import jax.numpy as jnp
from jax.experimental import pallas as pl
from jax.experimental.pallas import tpu as pltpu


def _make_shuffle_kernel(groups: int, cpg: int):
    c = groups * cpg

    def kernel(x_ref, o_ref):
        # x_ref / o_ref: (1, C, THW) VMEM tiles.
        # Channel shuffle is a static row permutation -> unrolled lane-dense
        # row copies (each row is THW contiguous lanes).
        for c_out in range(c):
            g = c_out % groups
            j = c_out // groups
            c_in = g * cpg + j
            o_ref[0, c_out, :] = x_ref[0, c_in, :]

    return kernel


def _spatial_tile(hw: int, c: int, itemsize: int, target_bytes: int = 2 << 20) -> int:
    """Pick a lane-aligned divisor of hw keeping one (C, THW) block <= ~2 MiB."""
    if hw * c * itemsize <= target_bytes or hw % 128 != 0:
        return hw  # small or not lane-alignable: take the full spatial extent
    best = hw
    for t in range(128, hw, 128):
        if hw % t == 0 and t * c * itemsize <= target_bytes:
            best = t  # largest qualifying divisor wins
    return best


def channel_shuffle(x_nchw: jax.Array, groups: int) -> jax.Array:
    """Equivalent of ShuffleChannel.forward: NCHW in, NCHW out."""
    N, C, H, W = x_nchw.shape
    assert C % groups == 0, "channels must be divisible by groups"
    cpg = C // groups
    if groups == 1 or cpg == 1:
        return x_nchw  # identity permutation, nothing to do

    hw = H * W
    x3 = x_nchw.reshape(N, C, hw)  # free reshape (merges trailing dims)
    thw = _spatial_tile(hw, C, x3.dtype.itemsize)
    grid = (N, hw // thw)

    y3 = pl.pallas_call(
        _make_shuffle_kernel(groups, cpg),
        out_shape=jax.ShapeDtypeStruct((N, C, hw), x3.dtype),
        grid_spec=pltpu.PrefetchScalarGridSpec(
            num_scalar_prefetch=0,
            grid=grid,
            in_specs=[pl.BlockSpec((1, C, thw), lambda n, s: (n, 0, s))],
            out_specs=pl.BlockSpec((1, C, thw), lambda n, s: (n, 0, s)),
        ),
        compiler_params=pltpu.CompilerParams(
            dimension_semantics=("parallel", "parallel"),
        ),
    )(x3)
    return y3.reshape(N, C, H, W)


def _reference(x_nchw: jax.Array, groups: int) -> jax.Array:
    N, C, H, W = x_nchw.shape
    cpg = C // groups
    y = x_nchw.reshape(N, groups, cpg, H, W)
    y = jnp.transpose(y, (0, 2, 1, 3, 4))
    return y.reshape(N, C, H, W)


if __name__ == "__main__":
    key = jax.random.PRNGKey(0)

    N, C, H, W = 2, 4, 16, 16
    groups = 2  # ShuffleChannel(groups=2)
    x = jax.random.normal(key, (N, C, H, W), dtype=jnp.float32)

    out = channel_shuffle(x, groups)
    out = jax.block_until_ready(out)

    ref = _reference(x, groups)
    assert out.shape == (N, C, H, W)
    # Pure data movement: result must be bit-exact.
    assert bool(jnp.all(out == ref)), "mismatch vs reference channel_shuffle"

    print("KERNEL_OK")
</pallas_src>

<mosaic_0001>
module attributes {stable_mosaic.version = 11 : i64} {
  func.func @kernel(%arg0: i32, %arg1: i32, %arg2: memref<1x4x256xf32, #tpu.memory_space<vmem>>, %arg3: memref<1x4x256xf32, #tpu.memory_space<vmem>>) attributes {dimension_semantics = [#tpu.dimension_semantics<parallel>, #tpu.dimension_semantics<parallel>], iteration_bounds = array<i64: 2, 1>, scalar_prefetch = 0 : i64, scratch_operands = 0 : i64, tpu.core_type = #tpu.core_type<tc>, window_params = [{transform_indices = @transform_0, window_bounds = array<i64: 1, 4, 256>}, {transform_indices = @transform_1, window_bounds = array<i64: 1, 4, 256>}]} {
    %c0 = arith.constant 0 : index
    %c0_0 = arith.constant 0 : index
    %c0_1 = arith.constant 0 : index
    %0 = vector.load %arg2[%c0, %c0_0, %c0_1] : memref<1x4x256xf32, #tpu.memory_space<vmem>>, vector<1x1x256xf32>
    %1 = vector.shape_cast %0 : vector<1x1x256xf32> to vector<256xf32>
    %c0_2 = arith.constant 0 : index
    %c0_3 = arith.constant 0 : index
    %c0_4 = arith.constant 0 : index
    %2 = vector.load %arg3[%c0_2, %c0_3, %c0_4] : memref<1x4x256xf32, #tpu.memory_space<vmem>>, vector<1x1x256xf32>
    %3 = vector.shape_cast %2 : vector<1x1x256xf32> to vector<256xf32>
    %4 = vector.shape_cast %1 : vector<256xf32> to vector<1x1x256xf32>
    tpu.vector_store %arg3[%c0_2, %c0_3, %c0_4], %4 {strides = array<i32>} : memref<1x4x256xf32, #tpu.memory_space<vmem>>, vector<1x1x256xf32>,
    %c0_5 = arith.constant 0 : index
    %c2 = arith.constant 2 : index
    %c0_6 = arith.constant 0 : index
    %5 = vector.load %arg2[%c0_5, %c2, %c0_6] : memref<1x4x256xf32, #tpu.memory_space<vmem>>, vector<1x1x256xf32>
    %6 = vector.shape_cast %5 : vector<1x1x256xf32> to vector<256xf32>
    %c0_7 = arith.constant 0 : index
    %c1 = arith.constant 1 : index
    %c0_8 = arith.constant 0 : index
    %7 = vector.load %arg3[%c0_7, %c1, %c0_8] : memref<1x4x256xf32, #tpu.memory_space<vmem>>, vector<1x1x256xf32>
    %8 = vector.shape_cast %7 : vector<1x1x256xf32> to vector<256xf32>
    %9 = vector.shape_cast %6 : vector<256xf32> to vector<1x1x256xf32>
    tpu.vector_store %arg3[%c0_7, %c1, %c0_8], %9 {strides = array<i32>} : memref<1x4x256xf32, #tpu.memory_space<vmem>>, vector<1x1x256xf32>,
    %c0_9 = arith.constant 0 : index
    %c1_10 = arith.constant 1 : index
    %c0_11 = arith.constant 0 : index
    %10 = vector.load %arg2[%c0_9, %c1_10, %c0_11] : memref<1x4x256xf32, #tpu.memory_space<vmem>>, vector<1x1x256xf32>
    %11 = vector.shape_cast %10 : vector<1x1x256xf32> to vector<256xf32>
    %c0_12 = arith.constant 0 : index
    %c2_13 = arith.constant 2 : index
    %c0_14 = arith.constant 0 : index
    %12 = vector.load %arg3[%c0_12, %c2_13, %c0_14] : memref<1x4x256xf32, #tpu.memory_space<vmem>>, vector<1x1x256xf32>
    %13 = vector.shape_cast %12 : vector<1x1x256xf32> to vector<256xf32>
    %14 = vector.shape_cast %11 : vector<256xf32> to vector<1x1x256xf32>
    tpu.vector_store %arg3[%c0_12, %c2_13, %c0_14], %14 {strides = array<i32>} : memref<1x4x256xf32, #tpu.memory_space<vmem>>, vector<1x1x256xf32>,
    %c0_15 = arith.constant 0 : index
    %c3 = arith.constant 3 : index
    %c0_16 = arith.constant 0 : index
    %15 = vector.load %arg2[%c0_15, %c3, %c0_16] : memref<1x4x256xf32, #tpu.memory_space<vmem>>, vector<1x1x256xf32>
    %16 = vector.shape_cast %15 : vector<1x1x256xf32> to vector<256xf32>
    %c0_17 = arith.constant 0 : index
    %c3_18 = arith.constant 3 : index
    %c0_19 = arith.constant 0 : index
    %17 = vector.load %arg3[%c0_17, %c3_18, %c0_19] : memref<1x4x256xf32, #tpu.memory_space<vmem>>, vector<1x1x256xf32>
    %18 = vector.shape_cast %17 : vector<1x1x256xf32> to vector<256xf32>
    %19 = vector.shape_cast %16 : vector<256xf32> to vector<1x1x256xf32>
    tpu.vector_store %arg3[%c0_17, %c3_18, %c0_19], %19 {strides = array<i32>} : memref<1x4x256xf32, #tpu.memory_space<vmem>>, vector<1x1x256xf32>,
    return
  }
  func.func @transform_0(%arg0: i32, %arg1: i32) -> (i32, i32, i32) {
    %c0_i32 = arith.constant 0 : i32
    %c0_i32_0 = arith.constant 0 : i32
    return %arg0, %c0_i32, %arg1 : i32, i32, i32
  }
  func.func @transform_1(%arg0: i32, %arg1: i32) -> (i32, i32, i32) {
    %c0_i32 = arith.constant 0 : i32
    %c0_i32_0 = arith.constant 0 : i32
    return %arg0, %c0_i32, %arg1 : i32, i32, i32
  }
}

</mosaic_0001>

<bundles_post_ra>
// kernel: tpu_custom_call.1
= control target key start
LH: loop header
LB: loop body
LE: loop exit
PB: predicated region body
PF: predicated region fallthrough
CT: control target
= control target key end

     0   :  { %6 = vsyncpa [#allocation3], 0  ;;  %s655_s0 = inlined_call_operand.hbm [shape: f32[2,4,256], index: 0, kind: input, shape index: {}]   ;;  %s656_s1 = inlined_call_operand.hbm [shape: f32[2,4,256], index: 1, kind: output, shape index: {}]  }
   0x1   :  { %8 = vsyncpa [#allocation3 + $0x1], 0 }
   0x2   :  { %9 = vsyncpa [#allocation4], 0 }
   0x3   :  { %11 = vsyncpa [#allocation4 + $0x1], 0  ;;  %s483_s6 = smov 0   ;;  %s485_s7 = smov 0  }
   0x4   :  { %s487_s8 = smov 0   ;;  %s489_s9 = smov 0  }
   0x5   :  { %s491_s10 = smov 0   ;;  %s493_s11 = smov 0  }
   0x6 LB: > { %s272_s12 = sadd.s32 4294967295, %s469_s11   ;;  %s273_s13 = sadd.s32 4294967294, %s469_s11   ;;  %s469_s11 = sphi %s493_s11, %s17_s11   ;;  %s465_s10 = sphi %s491_s10, %s672_s10   ;;  %s461_s9 = sphi %s489_s9, %s671_s9   ;;  %s457_s8 = sphi %s487_s8, %s670_s8   ;;  %s453_s7 = sphi %s485_s7, %s669_s7   ;;  %s449_s6 = sphi %s483_s6, %s668_s6  }
   0x7   : > { %s29_s14 = sadd.s32 1, %s465_s10  ;;  %s38_s15 = sadd.s32 1, %s457_s8 }
   0x8   : > { %p31_p0 = scmp.ge.s32.totalorder %s29_s14, 2  ;;  %p45_p1 = scmp.ne.s32.totalorder %s457_s8, %s453_s7 }
   0x9   : > { %p46_p2 = scmp.eq.s32.totalorder %s469_s11, 0  ;;  %p51_p3 = scmp.ne.s32.totalorder %s453_s7, %s449_s6 }
   0xa   : > { %s674_s14 = smov (%p31_p0, %s29_s14), 0  ;;  %p52_p5 = scmp.eq.s32.totalorder %s272_s12, 0 }
   0xb   : > { %p524_p4 = por %p46_p2, %p45_p1  ;;  %s33_s17 = ssub.s32 %s465_s10, %s674_s14 }
   0xc   : > { %p77_p6 = scmp.eq.s32.totalorder %s272_s12, 1  ;;  %p36_p7 = scmp.eq.s32.totalorder %s33_s17, 0 }
   0xd   : > { %p530_p8 = por %p52_p5, %p51_p3  ;;  %p83_p10 = scmp.eq.s32.totalorder %s273_s13, 1 }
   0xe   : > { %p534_p9 = por %p77_p6, %p45_p1  ;;  %p307_p13 = scmp.lt.s32.totalorder %s469_s11, 2 }
   0xf   : > { %s539_s20 = scalar_select %p36_p7, %s457_s8, %s38_s15  }
  0x10   : > { %s660_s19 = scalar_select %p534_p9, 1, 0 }
  0x11   : > { %p541_p11 = por %p83_p10, %p51_p3  ;;  %s103_s22 = sand.u32 1, %s457_s8  }
  0x12   : > { %s276_s23 = sshll.u32 %s103_s22, 3  ;;  %s293_s24 = sshll.u32 %s465_s10, 7 }
  0x13   : > { %s661_s21 = scalar_select %p541_p11, 1, 0 }
  0x14   : > { %s552_s27 = scalar_lea.hbm %s655_s0, %s293_s24  ;;  %s107_s28 = scalar_lea.vmem [#allocation2], %s276_s23 }
  0x15   : > { %s117_s29 = sshll.u32 %s107_s28, 4  ;;  %p558_p0 = pnand %p307_p13, %p524_p4  ;;  %s554_s29 = int_to_ptr.vmem [resolvable:$true] %s117_s29 }
  0x16   : > { %s104_s2 = scalar_lea.sflag [#allocation3], %s103_s22  ;;  %s357_s3 = scalar_lea.hbm %s552_s27, 128 }
  0x17   : > { %p358_p3 = scmp.ne.s32.totalorder %s552_s27, %s357_s3  ;;  %p359_p5 = pneg %p558_p0 }
  0x18   : > { %s362_s12 = scalar_lea.hbm %s655_s0, 256  ;;  %p363_p4 = scmp.lt.u32.totalorder %s552_s27, %s655_s0 }
  0x19   : > { %p360_p6 = pnand %p359_p5, %p358_p3  ;;  %p364_p10 = scmp.lt.u32.totalorder %s362_s12, %s357_s3 }
  0x1a   : > { %p366_p12 = scmp.lt.u32.totalorder %s357_s3, %s552_s27 }
  0x1b   : > { %p361_p7 = pneg %p360_p6  ;;  %p365_p13 = por %p364_p10, %p363_p4 }
  0x1d   : > { %p367_p1 = por %p366_p12, %p365_p13 }
  0x1f   : > { %p368_p2 = pnand %p367_p1, %p361_p7 }
  0x21   : > { %371 = shalt.err (!%p368_p2)
}
  0x22   : > { %s372_s16 = scalar_lea.vmem %s554_s29, 128  ;;  %s471_s17 = smov [#allocation2]  }
  0x23   : > { %p373_p3 = scmp.ne.s32.totalorder %s554_s29, %s372_s16  ;;  %s377_s22 = sshll.u32 %s471_s17, 4  ;;  %s378_s22 = int_to_ptr.vmem [resolvable:$false] %s377_s22 }
  0x24   : > { %s379_s23 = scalar_lea.vmem %s378_s22, 256  ;;  %p380_p9 = scmp.lt.s32.totalorder %s554_s29, %s378_s22 }
  0x25   : > { %p375_p6 = pnand %p373_p3, %p359_p5  ;;  %p381_p4 = scmp.lt.s32.totalorder %s379_s23, %s372_s16 }
  0x27   : > { %p376_p11 = pneg %p375_p6  ;;  %p382_p10 = por %p381_p4, %p380_p9 }
  0x29   : > { %p383_p12 = pnand %p382_p10, %p376_p11 }
  0x2b   : > { %386 = shalt.err (!%p383_p12)
}
  0x2c   : > { %302 = dma.hbm_to_vmem [thread:$0]  (!%p558_p0), %s552_s27, 128, %s554_s29, %s104_s2  }
  0x2d   : > { %p663_p1 = scmp.lt.s32.totalorder %s469_s11, 3  ;;  %p664_p2 = scmp.ge.s32.totalorder %s469_s11, 1 }
  0x2f   : > { %p123_p5 = pnand %p664_p2, %p663_p1 }
  0x30   : > { %s594_s24 = sand.u32 (!%p123_p5), 1, %s453_s7  }
  0x31   : > { %126 = sbr.rel (%p123_p5) target bundleno = 84 (0x54), region = 24  ;;  %s280_s25 = sshll.u32 (!%p123_p5), %s594_s24, 3 }
  0x32   : > { %s129_s26 = scalar_lea.sflag (!%p123_p5), [#allocation3], %s594_s24  ;;  %s132_s28 = scalar_lea.vmem (!%p123_p5), [#allocation2], %s280_s25 }
  0x38   : > { %440 = dma.done.wait (%p530_p8), %s129_s26, 128  }
  0x39   : > { %442 = vsyncadd (%p530_p8), %s129_s26, 4294967168  ;;  %v154_v0 = vlaneseq  ;;  %s150_s27 = scalar_lea.vmem [#allocation5], %s280_s25  ;;  %s294_s30 = sshll.u32 %s461_s9, 7  ;;  %v153_v1 = vld [vmem:[%s132_s28] ss:$4 sm:$0x3] }
  0x3a   : > { %s188_s29 = sshll.u32 %s150_s27, 4  ;;  %v282_v2 = vld [vmem:[%s132_s28 + $0x2] ss:$4 sm:$0x3]  ;;  %s608_s4 = scalar_lea.hbm %s656_s1, %s294_s30  ;;  %s603_s29 = int_to_ptr.vmem [resolvable:$true] %s188_s29 }
  0x3b   : > { %vm156_vm0 = vcmp.lt.s32.totalorder %v154_v0, 256  ;;  %v284_v3 = vld [vmem:[%s132_s28 + $0x1] ss:$4 sm:$0x3]  ;;  %s172_s9 = scalar_lea.sflag [#allocation4], %s594_s24  ;;  %s387_s18 = scalar_lea.vmem %s603_s29, 128 }
  0x3c   : > { %158 = vst.msk [vmem:[%s150_s27] ss:$4 sm:$0x3] %vm156_vm0, %v153_v1  ;;  %283 = vst.msk [vmem:[%s150_s27 + $0x1] ss:$4 sm:$0x3] %vm156_vm0, %v282_v2  ;;  %p388_p8 = scmp.ne.s32.totalorder %s603_s29, %s387_s18 }
  0x3d   : > { %v286_v4 = vld [vmem:[%s132_s28 + $0x3] ss:$4 sm:$0x3]  ;;  %285 = vst.msk [vmem:[%s150_s27 + $0x2] ss:$4 sm:$0x3] %vm156_vm0, %v284_v3 }
  0x3e   : > { %287 = vst.msk [vmem:[%s150_s27 + $0x3] ss:$4 sm:$0x3] %vm156_vm0, %v286_v4  ;;  %p665_p9 = scmp.ne.s32.totalorder %s660_s19, 0  ;;  %s472_s5 = smov [#allocation5]  }
  0x3f   : > { %s391_s12 = sshll.u32 %s472_s5, 4  ;;  %s392_s12 = int_to_ptr.vmem [resolvable:$false] %s391_s12 }
  0x40   : > { %p389_p11 = pnand %p388_p8, %p665_p9  ;;  %s393_s13 = scalar_lea.vmem %s392_s12, 256 }
  0x41   : > { %p394_p7 = scmp.lt.s32.totalorder %s603_s29, %s392_s12  ;;  %p395_p13 = scmp.lt.s32.totalorder %s393_s13, %s387_s18 }
  0x42   : > { %p390_p0 = pneg %p389_p11 }
  0x43   : > { %p396_p3 = por %p395_p13, %p394_p7 }
  0x45   : > { %p397_p6 = pnand %p396_p3, %p390_p0 }
  0x47   : > { %400 = shalt.err (!%p397_p6)
}
  0x48   : > { %s401_s15 = scalar_lea.hbm %s608_s4, 128  ;;  %s405_s22 = scalar_lea.hbm %s656_s1, 256 }
  0x49   : > { %p402_p4 = scmp.ne.s32.totalorder %s608_s4, %s401_s15  ;;  %p406_p1 = scmp.lt.u32.totalorder %s608_s4, %s656_s1 }
  0x4a   : > { %p407_p2 = scmp.lt.u32.totalorder %s405_s22, %s401_s15  ;;  %p409_p8 = scmp.lt.u32.totalorder %s401_s15, %s608_s4 }
  0x4b   : > { %p403_p10 = pnand %p402_p4, %p665_p9 }
  0x4c   : > { %p408_p5 = por %p407_p2, %p406_p1 }
  0x4d   : > { %p404_p12 = pneg %p403_p10 }
  0x4e   : > { %p410_p11 = por %p409_p8, %p408_p5 }
  0x50   : > { %p411_p0 = pnand %p410_p11, %p404_p12 }
  0x52   : > { %414 = shalt.err (!%p411_p0)
}
  0x53   : > { %297 = dma.vmem_to_hbm [thread:$0]  (%p665_p9), %s603_s29, 128, %s608_s4, %s172_s9  }
  0x54 PF: > { %s200_s25 = sand.u32 1, %s449_s6   ;;  %p666_p7 = scmp.ne.s32.totalorder %s661_s21, 0 }
  0x55   : > { %p667_p13 = scmp.ge.s32.totalorder %s469_s11, 2  ;;  %s201_s26 = scalar_lea.sflag [#allocation4], %s200_s25 }
  0x57   : > { %p304_p3 = pnand %p667_p13, %p666_p7 }
  0x59   : > { %444 = dma.done.wait (!%p304_p3), %s201_s26, 128  }
  0x5a   : > { %446 = vsyncadd (!%p304_p3), %s201_s26, 4294967168  ;;  %s17_s11 = sadd.s32 1, %s469_s11   ;;  %s668_s6 = smov %s453_s7 }
  0x5b   : > { %p14_p6 = scmp.ge.s32.totalorder %s17_s11, 4   ;;  %s669_s7 = smov %s457_s8 }
  0x5c   : > { %s670_s8 = smov %s539_s20  ;;  %s671_s9 = smov %s465_s10 }
  0x5d   : > { %s672_s10 = smov %s674_s14  ;;  %16 = sbr.rel (!%p14_p6) target bundleno = 6 (0x6), region = 75 }
  0x64   :  { %206 = vsyncpa [#allocation3], 1 }
  0x65   :  { %208 = vsyncpa [#allocation3 + $0x1], 1 }
  0x66   :  { %209 = vsyncpa [#allocation4], 1 }
  0x67   :  { %211 = vsyncpa [#allocation4 + $0x1], 1 }

</bundles_post_ra>
